<compile_context>
chip_gen: v7x
topology: tpu7x:2x2x1
jax: 0.10.0
libtpu: 0.0.40
codegen_flags: <defaults>
</compile_context>

<pallas_src>
import functools

import jax
import jax.numpy as jnp
from jax.experimental import pallas as pl
from jax.experimental.pallas import tpu as pltpu

_LANE = 128
_TARGET_TILE_M = 1024


def _generator_kernel(x_ref, wt_ref, bt_ref, o_ref, *, compute_dtype):
    # x_ref:  (tile_m, d_model)        x dtype (f32 or bf16) straight from HBM
    # wt_ref: (num_types, d_model)     matmul dtype (resident block)
    # bt_ref: (num_types, 1)           f32 (resident block)
    # o_ref:  (num_types, tile_m)      lane-dense output block
    x = x_ref[...]
    if compute_dtype is not None and x.dtype != jnp.dtype(compute_dtype):
        x = x.astype(compute_dtype)  # per-tile cast: no extra HBM pass
    # logits^T[t, m] = sum_d W[d, t] * x[m, d]  (trans-b matmul, lane-dense m)
    logits = jax.lax.dot_general(
        wt_ref[...], x,
        dimension_numbers=(((1,), (1,)), ((), ())),
        preferred_element_type=jnp.float32)
    logits = logits + bt_ref[...]
    # Numerically-stable softmax over the num_types (sublane) axis, all in f32.
    m = jnp.max(logits, axis=0, keepdims=True)
    e = jnp.exp(logits - m)
    denom = jnp.sum(e, axis=0, keepdims=True)
    o_ref[...] = (e / denom).astype(o_ref.dtype)


def _round_up(x, m):
    return ((x + m - 1) // m) * m


def _vmem_capacity_bytes():
    try:
        cap = getattr(pltpu.get_tpu_info(), "vmem_capacity_bytes", None)
        if cap:
            return int(cap)
    except Exception:
        pass
    return 64 * 1024 * 1024  # v7x per-TC capacity: safe lower bound everywhere


def _pick_tile_m(n_rows, d_model, num_types, x_bytes, mm_bytes, out_bytes,
                 vmem_cap):
    """Row tile: big enough to amortize the ~0.35us/step pipeline overhead,
    small enough that double-buffered x/out blocks plus the resident weight
    block fit comfortably in VMEM (honest accounting for v7x's 64 MiB), and
    split into >= 2 grid steps when the row count allows it (v7x megacore).
    tile_m is the output's lane dim, so it is a multiple of 128 unless it
    covers the whole row count."""
    if n_rows <= _LANE:
        return n_rows  # single block; block dims == full array dims
    resident = 2 * num_types * d_model * mm_bytes + 2 * num_types * 4
    budget = max(4 << 20, int(vmem_cap * 0.45) - resident)
    per_row = 2 * (d_model * x_bytes + num_types * out_bytes)  # 2x: pipelining
    tile = min(_TARGET_TILE_M,
               max(_LANE, (budget // per_row) // _LANE * _LANE))
    if n_rows <= tile:
        # Would collapse to a single grid step: split so both v7x TCs get work.
        tile = _round_up(pl.cdiv(n_rows, 2), _LANE)
    return tile


def _vmem_limit_bytes(tile_m, d_model, num_types, x_bytes, mm_bytes, out_bytes,
                      vmem_cap):
    usage = (2 * tile_m * d_model * x_bytes          # x blocks (double-buffered)
             + 2 * tile_m * num_types * out_bytes    # output blocks
             + 2 * num_types * d_model * mm_bytes    # resident weight
             + 2 * num_types * 4)                    # resident bias
    # Generous headroom for compiler-internal scratch, clamped below the
    # physical capacity of the smallest part (v7x: 64 MiB per TensorCore);
    # v5e/v6e (128 MiB) naturally get the larger budgets.
    return int(min(vmem_cap * 15 // 16, max(usage * 2, 32 << 20)))


def generator_forward(x, weight, bias, *, tile_m=None, compute_dtype=None):
    """softmax(x @ weight + bias, axis=-1)  ==  torch Generator.forward.

    x:      [B, S, d_model]           (any float dtype; streamed from HBM once)
    weight: [d_model, num_types]      (transposed vs. torch nn.Linear.weight)
    bias:   [num_types]
    compute_dtype: optional matmul dtype (e.g. jnp.bfloat16). The cast happens
        per tile inside the kernel, so it buys MXU throughput but NOT HBM
        bandwidth; to halve x traffic (worth ~2x on v5e) store x as bf16 and
        leave compute_dtype=None.
    """
    B, S, d_model = x.shape
    num_types = weight.shape[1]
    N = B * S
    out_dtype = x.dtype

    mm_dtype = (jnp.dtype(compute_dtype) if compute_dtype is not None
                else jnp.dtype(x.dtype))
    x2d = x.reshape(N, d_model)                    # metadata only, no HBM copy
    wt = weight.T.astype(mm_dtype)                 # (num_types, d_model), tiny
    bt = bias.reshape(num_types, 1).astype(jnp.float32)

    x_bytes = jnp.dtype(x.dtype).itemsize
    out_bytes = jnp.dtype(out_dtype).itemsize
    mm_bytes = mm_dtype.itemsize
    vmem_cap = _vmem_capacity_bytes()
    if tile_m is None:
        tile_m = _pick_tile_m(N, d_model, num_types, x_bytes, mm_bytes,
                              out_bytes, vmem_cap)
    assert tile_m == N or tile_m % _LANE == 0, (
        "tile_m is the output lane dim: must be a multiple of 128 or == B*S")

    grid = pl.cdiv(N, tile_m)
    kernel = functools.partial(
        _generator_kernel,
        compute_dtype=None if mm_dtype == jnp.dtype(x.dtype) else mm_dtype)

    out_t = pl.pallas_call(
        kernel,
        out_shape=jax.ShapeDtypeStruct((num_types, N), out_dtype),
        grid_spec=pltpu.PrefetchScalarGridSpec(
            num_scalar_prefetch=0,
            grid=(grid,),
            in_specs=[
                pl.BlockSpec((tile_m, d_model), lambda i: (i, 0)),
                pl.BlockSpec((num_types, d_model), lambda i: (0, 0)),
                pl.BlockSpec((num_types, 1), lambda i: (0, 0)),
            ],
            out_specs=pl.BlockSpec((num_types, tile_m), lambda i: (0, i)),
        ),
        compiler_params=pltpu.CompilerParams(
            dimension_semantics=("parallel",),   # row tiles shard across v7x TCs
            vmem_limit_bytes=_vmem_limit_bytes(tile_m, d_model, num_types,
                                               x_bytes, mm_bytes, out_bytes,
                                               vmem_cap),
        ),
        cost_estimate=pl.CostEstimate(
            flops=2 * N * d_model * num_types,
            transcendentals=N * num_types,
            bytes_accessed=(N * d_model * x_bytes
                            + num_types * d_model * mm_bytes
                            + num_types * 4
                            + N * num_types * out_bytes),
        ),
    )(x2d, wt, bt)

    # (num_types, N) -> (B, S, num_types). Transposing the small output slab in
    # the wrapper is layout plumbing (~num_types/d_model of the x traffic).
    return out_t.T.reshape(B, S, num_types)


def reference_forward(x, weight, bias):
    logits = jnp.einsum("bsd,dk->bsk", x, weight) + bias
    return jax.nn.softmax(logits, axis=-1)


if __name__ == "__main__":
    key = jax.random.PRNGKey(0)

    def make_inputs(B, S, d_model, num_types, k):
        kx, kw, kb = jax.random.split(k, 3)
        bound = float(d_model) ** -0.5   # nn.Linear default uniform init
        weight = jax.random.uniform(kw, (d_model, num_types), jnp.float32,
                                    -bound, bound)
        bias = jax.random.uniform(kb, (num_types,), jnp.float32, -bound, bound)
        x = jax.random.normal(kx, (B, S, d_model), jnp.float32)
        return x, weight, bias

    k1, k2 = jax.random.split(key)

    # Small shapes consistent with Generator(d_model=32, num_mental_types=4).
    x, w, b = make_inputs(2, 8, 32, 4, k1)
    out = jax.block_until_ready(generator_forward(x, w, b))
    ref = reference_forward(x, w, b)
    assert out.shape == (2, 8, 4)
    assert jnp.allclose(out, ref, atol=5e-3, rtol=5e-3)
    assert jnp.allclose(jnp.sum(out, axis=-1), 1.0, atol=1e-3)

    # Larger ragged shape: exercises the boundary-masked tail block (no
    # wrapper pad) and the >=2-step grid split for v7x megacore.
    x2, w2, b2 = make_inputs(3, 100, 128, 6, k2)
    out2 = jax.block_until_ready(generator_forward(x2, w2, b2))
    ref2 = reference_forward(x2, w2, b2)
    assert out2.shape == (3, 100, 6)
    assert jnp.allclose(out2, ref2, atol=5e-3, rtol=5e-3)
    assert jnp.allclose(jnp.sum(out2, axis=-1), 1.0, atol=1e-3)

    # In-kernel bf16 matmul path (x stays f32 in HBM; softmax math stays f32).
    out3 = jax.block_until_ready(
        generator_forward(x2, w2, b2, compute_dtype=jnp.bfloat16))
    assert jnp.allclose(out3, ref2, atol=2e-2, rtol=2e-2)
    assert jnp.allclose(jnp.sum(out3, axis=-1), 1.0, atol=1e-3)

    print("KERNEL_OK")
</pallas_src>

<mosaic_0001>
module attributes {stable_mosaic.version = 11 : i64} {
  func.func @_generator_kernel(%arg0: i32, %arg1: memref<16x32xf32, #tpu.memory_space<vmem>>, %arg2: memref<4x32xf32, #tpu.memory_space<vmem>>, %arg3: memref<4x1xf32, #tpu.memory_space<vmem>>, %arg4: memref<4x16xf32, #tpu.memory_space<vmem>>) attributes {dimension_semantics = [#tpu.dimension_semantics<parallel>], iteration_bounds = array<i64: 1>, scalar_prefetch = 0 : i64, scratch_operands = 0 : i64, tpu.core_type = #tpu.core_type<tc>, window_params = [{transform_indices = @transform_0, window_bounds = array<i64: 16, 32>}, {pipeline_mode = #tpu.pipeline_mode<synchronous>, transform_indices = @transform_1, window_bounds = array<i64: 4, 32>}, {pipeline_mode = #tpu.pipeline_mode<synchronous>, transform_indices = @transform_2, window_bounds = array<i64: 4, 1>}, {transform_indices = @transform_3, window_bounds = array<i64: 4, 16>}]} {
    %c0 = arith.constant 0 : index
    %c0_0 = arith.constant 0 : index
    %0 = vector.load %arg1[%c0, %c0_0] : memref<16x32xf32, #tpu.memory_space<vmem>>, vector<16x32xf32>
    %c0_1 = arith.constant 0 : index
    %c0_2 = arith.constant 0 : index
    %1 = vector.load %arg2[%c0_1, %c0_2] : memref<4x32xf32, #tpu.memory_space<vmem>>, vector<4x32xf32>
    %cst = arith.constant dense<0.000000e+00> : vector<4x16xf32>
    %2 = tpu.matmul %1, %0, %cst {dimension_numbers = #tpu.dot_dimension_numbers<[1], [1], [0], [0], [0, 0, 1, 0], [], []>} : vector<4x32xf32>, vector<16x32xf32>, vector<4x16xf32> -> vector<4x16xf32>
    %c0_3 = arith.constant 0 : index
    %c0_4 = arith.constant 0 : index
    %3 = vector.load %arg3[%c0_3, %c0_4] : memref<4x1xf32, #tpu.memory_space<vmem>>, vector<4x1xf32>
    %4 = vector.broadcast %3 : vector<4x1xf32> to vector<4x16xf32>
    %5 = arith.addf %2, %4 : vector<4x16xf32>
    %cst_5 = arith.constant dense<0xFF800000> : vector<16xf32>
    %6 = vector.multi_reduction <maximumf>, %5, %cst_5 [0] : vector<4x16xf32> to vector<16xf32>
    %7 = vector.shape_cast %6 : vector<16xf32> to vector<1x16xf32>
    %8 = vector.broadcast %7 : vector<1x16xf32> to vector<4x16xf32>
    %9 = arith.subf %5, %8 : vector<4x16xf32>
    %10 = math.exp %9 : vector<4x16xf32>
    %cst_6 = arith.constant dense<0.000000e+00> : vector<16xf32>
    %11 = vector.multi_reduction <add>, %10, %cst_6 [0] : vector<4x16xf32> to vector<16xf32>
    %12 = vector.shape_cast %11 : vector<16xf32> to vector<1x16xf32>
    %13 = vector.broadcast %12 : vector<1x16xf32> to vector<4x16xf32>
    %14 = arith.divf %10, %13 : vector<4x16xf32>
    %c0_7 = arith.constant 0 : index
    %c0_8 = arith.constant 0 : index
    %15 = vector.load %arg4[%c0_7, %c0_8] : memref<4x16xf32, #tpu.memory_space<vmem>>, vector<4x16xf32>
    tpu.vector_store %arg4[%c0_7, %c0_8], %14 {strides = array<i32>} : memref<4x16xf32, #tpu.memory_space<vmem>>, vector<4x16xf32>,
    return
  }
  func.func @transform_0(%arg0: i32) -> (i32, i32) {
    %c0_i32 = arith.constant 0 : i32
    %c0_i32_0 = arith.constant 0 : i32
    return %arg0, %c0_i32 : i32, i32
  }
  func.func @transform_1(%arg0: i32) -> (i32, i32) {
    %c0_i32 = arith.constant 0 : i32
    %c0_i32_0 = arith.constant 0 : i32
    %c0_i32_1 = arith.constant 0 : i32
    return %c0_i32, %c0_i32_0 : i32, i32
  }
  func.func @transform_2(%arg0: i32) -> (i32, i32) {
    %c0_i32 = arith.constant 0 : i32
    %c0_i32_0 = arith.constant 0 : i32
    %c0_i32_1 = arith.constant 0 : i32
    return %c0_i32, %c0_i32_0 : i32, i32
  }
  func.func @transform_3(%arg0: i32) -> (i32, i32) {
    %c0_i32 = arith.constant 0 : i32
    %c0_i32_0 = arith.constant 0 : i32
    return %c0_i32, %arg0 : i32, i32
  }
}

</mosaic_0001>

<bundles_post_ra>
// kernel: tpu_custom_call.1
= control target key start
LH: loop header
LB: loop body
LE: loop exit
PB: predicated region body
PF: predicated region fallthrough
CT: control target
= control target key end

     0   :  { %8 = vsyncpa [#allocation3], 0  ;;  %s293_s0 = inlined_call_operand.hbm [shape: f32[16,32], index: 0, kind: input, shape index: {}]   ;;  %s294_s1 = inlined_call_operand.vmem [shape: f32[4,32], index: 1, kind: input, shape index: {}]   ;;  %s295_s2 = inlined_call_operand.vmem [shape: f32[4,1], index: 2, kind: input, shape index: {}]   ;;  %s296_s3 = inlined_call_operand.hbm [shape: f32[4,16], index: 3, kind: output, shape index: {}]  }
   0x1   :  { %9 = vsyncpa [#allocation4], 0  ;;  %s232_s12 = smov [#allocation2]   ;;  %s184_s16 = scalar_lea.hbm %s293_s0, 256 }
   0x2   :  { %s15_s13 = sshll.u32 %s232_s12, 4  ;;  %p185_p0 = scmp.ne.s32.totalorder %s293_s0, %s184_s16  ;;  %s16_s13 = int_to_ptr.vmem [resolvable:$true] %s15_s13 }
   0x3   :  { %p188_p1 = scmp.lt.u32.totalorder %s184_s16, %s293_s0 }
   0x5   :  { %p190_p2 = pnand %p188_p1, %p185_p0 }
   0x7   :  { %193 = shalt.err (!%p190_p2)
}
   0x8   :  { %s194_s21 = scalar_lea.vmem %s16_s13, 256  ;;  %p199_p4 = scmp.lt.s32.totalorder %s16_s13, %s16_s13 }
   0x9   :  { %p195_p3 = scmp.ne.s32.totalorder %s16_s13, %s194_s21  ;;  %p200_p5 = scmp.lt.s32.totalorder %s194_s21, %s194_s21 }
   0xb   :  { %p201_p6 = por %p200_p5, %p199_p4 }
   0xd   :  { %p202_p7 = pnand %p201_p6, %p195_p3 }
   0xf   :  { %205 = shalt.err (!%p202_p7)
}
  0x10   :  { %s233_s22 = smov 128   ;;  %s234_s23 = smov 8  }
  0x11   :  { %21 = dma.hbm_to_vmem [thread:$0]  %s293_s0, 256, %s16_s13, [#allocation3], %s233_s22, %s233_s22, %s234_s23  }
  0x12   :  { %228 = dma.done.wait [#allocation3], 256  }
  0x13   :  { %229 = vsyncadd [#allocation3], 4294967040  ;;  %v235_v0 = vmov 0.0|0.0   ;;  %vm236_vm0 = vmmov 0   ;;  %v237_v1 = vmov 0.0   ;;  %v238_v2 = vmov 0  }
  0x14   :  { %167 = vmatprep.subr.bf16.mxu0 %v235_v0  ;;  %164 = vmatprep.mubr.msk.f32.mxu0 %vm236_vm0, %v237_v1  ;;  %vm38_vm1 = vcmask 261120   ;;  %v29_v3 = vld [vmem:[#allocation2] sm:$0xff]  ;;  %v30_v4 = vld [vmem:[#allocation2 + $0x8] sm:$0xff]  ;;  %vm118_vm3 = vcmask 125952  }
  0x15   :  { %179 = vset.pattern.permute.xlu0 %v238_v2  ;;  %vm169_vm2 = vmpackc.low %vm38_vm1, %vm38_vm1  ;;  %v168_v5 = vpack.c.bf16 %v30_v4, %v29_v3  ;;  %v32_v6 = vld [vmem:[%s295_s2] sm:$0xf] }
  0x16   :  { %35 = vperm.xlu0 %179, %v32_v6   ;;  %v31_v7 = vld [vmem:[%s294_s1] sm:$0xf]  ;;  %s239_s1 = smov [#allocation5]  }
  0x17   :  { %170 = vmatpush3.bf16.xpose.msk.msra.mxu0 %vm169_vm2, %v168_v5  ;;  %s145_s2 = sshll.u32 %s239_s1, 4  ;;  %s146_s2 = int_to_ptr.vmem [resolvable:$true] %s145_s2 }
  0x18   :  { %s206_s29 = scalar_lea.vmem %s146_s2, 64  ;;  %p211_p9 = scmp.lt.s32.totalorder %s146_s2, %s146_s2 }
  0x19   :  { %p207_p8 = scmp.ne.s32.totalorder %s146_s2, %s206_s29  ;;  %p212_p10 = scmp.lt.s32.totalorder %s206_s29, %s206_s29 }
  0x1b   :  { %p213_p11 = por %p212_p10, %p211_p9 }
  0x1d   :  { %p214_p12 = pnand %p213_p11, %p207_p8 }
  0x1e   :  { %165 = vmatmul.mubr.msk.f32.vlgmr.msra.gmra.mrb[0].mxu0 %vm38_vm1, %v31_v7 }
  0x95   :  { %v36_v8 = vpop.permute.xlu0 %35 }
  0xf1   :  { %v114_v9 = vpop.f32.mrb[0].mxu0 }
  0xf2   :  { %v115_v10 = vadd.f32 %v114_v9, %v36_v8  ;;  %v166_v11 = vpop.f32.mrb[1].mxu0 }
  0xf4   :  { %v119_v12 = vsel %vm118_vm3, %v115_v10, -inf }
  0xf5   :  { %v120_v13 = vrot.slane %v119_v12, 4 }
  0xf7   :  { %v121_v14 = vmax.f32 %v119_v12, %v120_v13 }
  0xf9   :  { %v122_v15 = vrot.slane %v121_v14, 2 }
  0xfb   :  { %v123_v16 = vmax.f32 %v121_v14, %v122_v15 }
  0xfd   :  { %v124_v17 = vrot.slane %v123_v16, 1 }
  0xff   :  { %v125_v18 = vmax.f32 %v123_v16, %v124_v17 }
 0x101   :  { %v126_v19 = vsub.f32 %v115_v10, %v125_v18 }
 0x103   :  { %v127_v20 = vmul.f32 1.442695, %v126_v19 }
 0x105   :  { %180 = vpow2.f32 %v127_v20 }
 0x10f   :  { %v181_v21 = vpop.eup %180 }
 0x110   :  { %v129_v22 = vsel %vm118_vm3, %v181_v21, 0.0 }
 0x111   :  { %v130_v23 = vrot.slane %v129_v22, 4 }
 0x113   :  { %v131_v24 = vadd.f32 %v130_v23, %v129_v22 }
 0x115   :  { %v132_v25 = vrot.slane %v131_v24, 2 }
 0x117   :  { %v133_v26 = vadd.f32 %v132_v25, %v131_v24 }
 0x119   :  { %v134_v27 = vrot.slane %v133_v26, 1 }
 0x11b   :  { %v135_v28 = vadd.f32 %v134_v27, %v133_v26 }
 0x11d   :  { %182 = vrcp.f32 %v135_v28 }
 0x127   :  { %v183_v29 = vpop.eup %182 }
 0x128   :  { %v137_v30 = vmul.f32 %v183_v29, %v181_v21 }
 0x12a   :  { %138 = vst.msk [vmem:[#allocation5] sm:$0xf] %vm118_vm3, %v137_v30 }
 0x12b   :  { %217 = shalt.err (!%p214_p12)
}
 0x12c   :  { %s218_s5 = scalar_lea.hbm %s296_s3, 64 }
 0x12d   :  { %p219_p13 = scmp.ne.s32.totalorder %s296_s3, %s218_s5  ;;  %p222_p0 = scmp.lt.u32.totalorder %s218_s5, %s296_s3 }
 0x12f   :  { %p224_p1 = pnand %p222_p0, %p219_p13 }
 0x131   :  { %227 = shalt.err (!%p224_p1)
}
 0x132   :  { %148 = dma.vmem_to_hbm [thread:$0]  %s146_s2, 64, %s296_s3, [#allocation4]  }
 0x133   :  { %230 = dma.done.wait [#allocation4], 64  }
 0x134   :  { %231 = vsyncadd [#allocation4], 4294967232 }
 0x135   :  { %152 = vsyncpa [#allocation3], 1 }
 0x136   :  { %153 = vsyncpa [#allocation4], 1 }

</bundles_post_ra>
